<compile_context>
chip_gen: v7x
topology: tpu7x:2x2x1
jax: 0.10.0
libtpu: 0.0.40
codegen_flags: <defaults>
</compile_context>

<pallas_src>
import math
import functools

import jax
import jax.numpy as jnp
from jax.experimental import pallas as pl
from jax.experimental.pallas import tpu as pltpu


def _block_kernel(x_ref,
                  ln1w_ref, ln1b_ref,
                  wqkv_ref, bqkv_ref,
                  wo_ref, bo_ref,
                  ln2w_ref, ln2b_ref,
                  wfc_ref, bfc_ref,
                  wpr_ref, bpr_ref,
                  out_ref,
                  *, n_head):
    x = x_ref[...].astype(jnp.float32)            # (T, C)  (batch dim squeezed by BlockSpec)
    T, C = x.shape
    hd = C // n_head
    eps = 1e-5                                    # PyTorch LayerNorm default
    mm = jnp.bfloat16                             # MXU operand dtype (f32 accumulation)

    def layernorm(v, w_ref, b_ref):
        mu = jnp.mean(v, axis=-1, keepdims=True)
        var = jnp.mean(jnp.square(v - mu), axis=-1, keepdims=True)
        return (v - mu) * jax.lax.rsqrt(var + eps) * w_ref[...] + b_ref[...]

    def split_heads(m2d):
        # (T, C) -> (n_head, T, hd). Head split is done ONCE per tensor
        # (lane slices stacked along a new leading batch axis); everything
        # below operates on all heads with a single batched dot_general.
        return jnp.stack([m2d[:, h * hd:(h + 1) * hd] for h in range(n_head)], axis=0)

    # ---------------- attention branch ----------------
    h = layernorm(x, ln1w_ref, ln1b_ref)
    qkv = jnp.dot(h.astype(mm), wqkv_ref[...],
                  preferred_element_type=jnp.float32) + bqkv_ref[...]      # (T, 3C) f32

    scale = 1.0 / math.sqrt(hd)
    q = split_heads(qkv[:, :C]) * scale           # fold the 1/sqrt(hd) into q (small tensor)
    k = split_heads(qkv[:, C:2 * C])
    v = split_heads(qkv[:, 2 * C:])

    # additive causal bias, built once and shared (broadcast) across heads
    row = jax.lax.broadcasted_iota(jnp.int32, (T, T), 0)
    col = jax.lax.broadcasted_iota(jnp.int32, (T, T), 1)
    causal_bias = jnp.where(row >= col, 0.0, -1e30).astype(jnp.float32)    # (T, T)

    # batched scores / softmax / weighted sum  (one dot_general each, all heads)
    s = jnp.einsum('hqd,hkd->hqk', q.astype(mm), k.astype(mm),
                   preferred_element_type=jnp.float32)                     # (H, T, T)
    s = s + causal_bias[None, :, :]
    s = s - jnp.max(s, axis=-1, keepdims=True)
    p = jnp.exp(s)
    p = p * pl.reciprocal(jnp.sum(p, axis=-1, keepdims=True), approx=True)
    y3 = jnp.einsum('hqk,hkd->hqd', p.astype(mm), v.astype(mm),
                    preferred_element_type=jnp.float32)                    # (H, T, hd)
    y = jnp.concatenate([y3[h] for h in range(n_head)], axis=-1)           # (T, C)

    attn_out = jnp.dot(y.astype(mm), wo_ref[...],
                       preferred_element_type=jnp.float32) + bo_ref[...]
    x = x + attn_out                               # residual 1 (resid_dropout = identity)

    # ---------------- MLP branch ----------------
    h2 = layernorm(x, ln2w_ref, ln2b_ref)
    f = jnp.dot(h2.astype(mm), wfc_ref[...],
                preferred_element_type=jnp.float32) + bfc_ref[...]
    # NewGELU (tanh approximation, exactly as in the PyTorch module) -- f32 elementwise
    g = 0.5 * f * (1.0 + jnp.tanh(math.sqrt(2.0 / math.pi) * (f + 0.044715 * (f * f * f))))
    mlp_out = jnp.dot(g.astype(mm), wpr_ref[...],
                      preferred_element_type=jnp.float32) + bpr_ref[...]
    x = x + mlp_out                                # residual 2 (dropout = identity)

    out_ref[...] = x.astype(out_ref.dtype)


def block_forward(x, params, n_head):
    B, T, C = x.shape
    kern = functools.partial(_block_kernel, n_head=n_head)

    def full_spec(arr):
        # weights / biases: whole array resident in VMEM, same block every step
        return pl.BlockSpec(arr.shape, lambda *_: (0,) * arr.ndim)

    weight_order = ["ln1_w", "ln1_b", "w_qkv", "b_qkv", "w_attn_proj", "b_attn_proj",
                    "ln2_w", "ln2_b", "w_fc", "b_fc", "w_mlp_proj", "b_mlp_proj"]
    weights = [params[k] for k in weight_order]

    # Grid over batch; the size-1 batch dim is squeezed out of the kernel view
    # (block_shape entry None == pl.Squeezed()) so tiles are lane-dense (T, C).
    # TODO(synk): at production T/C add a second (query-tile) grid axis with a
    # flash-style online softmax for more pipeline steps / v7x VMEM headroom;
    # at these toy shapes (T=8, C=32) a T tile cannot satisfy the (8,128)
    # constraint and the whole block fits VMEM, so the grid stays batch-only.
    return pl.pallas_call(
        kern,
        out_shape=jax.ShapeDtypeStruct((B, T, C), x.dtype),
        grid_spec=pltpu.PrefetchScalarGridSpec(
            num_scalar_prefetch=0,
            grid=(B,),
            in_specs=[pl.BlockSpec((None, T, C), lambda b: (b, 0, 0))]
                     + [full_spec(w) for w in weights],
            out_specs=pl.BlockSpec((None, T, C), lambda b: (b, 0, 0)),
        ),
        compiler_params=pltpu.CompilerParams(
            dimension_semantics=("parallel",),
            vmem_limit_bytes=32 * 1024 * 1024,
        ),
    )(x, *weights)


def make_params(key, n_embd):
    # Deterministic synthetic parameters. Linear weights are stored as (in, out),
    # i.e. already transposed relative to torch.nn.Linear's (out, in).
    # Weight matrices are stored in bf16 (MXU operand dtype / half the VMEM);
    # LN params and biases stay f32 (added to f32 accumulators).
    ks = jax.random.split(key, 8)
    s = 0.02
    f32, bf16 = jnp.float32, jnp.bfloat16

    def wmat(k, shape):
        return (s * jax.random.normal(k, shape, f32)).astype(bf16)

    def bvec(k, shape):
        return s * jax.random.normal(k, shape, f32)

    return {
        "ln1_w": jnp.ones((1, n_embd), f32),
        "ln1_b": jnp.zeros((1, n_embd), f32),
        "w_qkv": wmat(ks[0], (n_embd, 3 * n_embd)),
        "b_qkv": bvec(ks[1], (1, 3 * n_embd)),
        "w_attn_proj": wmat(ks[2], (n_embd, n_embd)),
        "b_attn_proj": bvec(ks[3], (1, n_embd)),
        "ln2_w": jnp.ones((1, n_embd), f32),
        "ln2_b": jnp.zeros((1, n_embd), f32),
        "w_fc": wmat(ks[4], (n_embd, 4 * n_embd)),
        "b_fc": bvec(ks[5], (1, 4 * n_embd)),
        "w_mlp_proj": wmat(ks[6], (4 * n_embd, n_embd)),
        "b_mlp_proj": bvec(ks[7], (1, n_embd)),
    }


def reference_forward(x, p, n_head):
    # Pure-JAX f32 reference mirroring the PyTorch Block (eval mode).
    B, T, C = x.shape
    hd = C // n_head
    f32 = jnp.float32

    def ln(v, w, b):
        mu = jnp.mean(v, axis=-1, keepdims=True)
        var = jnp.mean((v - mu) ** 2, axis=-1, keepdims=True)
        return (v - mu) / jnp.sqrt(var + 1e-5) * w + b

    h = ln(x, p["ln1_w"], p["ln1_b"])
    qkv = h @ p["w_qkv"].astype(f32) + p["b_qkv"]
    q, k, v = jnp.split(qkv, 3, axis=-1)
    q = q.reshape(B, T, n_head, hd).transpose(0, 2, 1, 3)
    k = k.reshape(B, T, n_head, hd).transpose(0, 2, 1, 3)
    v = v.reshape(B, T, n_head, hd).transpose(0, 2, 1, 3)
    att = (q @ jnp.swapaxes(k, -1, -2)) / math.sqrt(hd)
    mask = jnp.tril(jnp.ones((T, T), bool))
    att = jnp.where(mask, att, -jnp.inf)
    att = jax.nn.softmax(att, axis=-1)
    y = (att @ v).transpose(0, 2, 1, 3).reshape(B, T, C)
    x = x + (y @ p["w_attn_proj"].astype(f32) + p["b_attn_proj"])

    h2 = ln(x, p["ln2_w"], p["ln2_b"])
    f = h2 @ p["w_fc"].astype(f32) + p["b_fc"]
    g = 0.5 * f * (1.0 + jnp.tanh(math.sqrt(2.0 / math.pi) * (f + 0.044715 * f ** 3)))
    return x + (g @ p["w_mlp_proj"].astype(f32) + p["b_mlp_proj"])


if __name__ == "__main__":
    B, T, n_embd, n_head = 2, 8, 32, 4   # block_size = T = 8
    key = jax.random.PRNGKey(0)
    kx, kp = jax.random.split(key)

    x = jax.random.normal(kx, (B, T, n_embd), jnp.float32)
    params = make_params(kp, n_embd)

    out = jax.block_until_ready(block_forward(x, params, n_head))
    ref = reference_forward(x, params, n_head)

    assert out.shape == (B, T, n_embd)
    # bf16 MXU operands (f32 accumulation) vs f32 reference -> loosened tolerance
    assert jnp.allclose(out, ref, atol=2e-2, rtol=2e-2), "mismatch vs reference"
    print("KERNEL_OK")
</pallas_src>

<mosaic_0001>
module attributes {stable_mosaic.version = 11 : i64} {
  func.func @_block_kernel(%arg0: i32, %arg1: memref<1x8x32xf32, #tpu.memory_space<vmem>>, %arg2: memref<1x32xf32, #tpu.memory_space<vmem>>, %arg3: memref<1x32xf32, #tpu.memory_space<vmem>>, %arg4: memref<32x96xbf16, #tpu.memory_space<vmem>>, %arg5: memref<1x96xf32, #tpu.memory_space<vmem>>, %arg6: memref<32x32xbf16, #tpu.memory_space<vmem>>, %arg7: memref<1x32xf32, #tpu.memory_space<vmem>>, %arg8: memref<1x32xf32, #tpu.memory_space<vmem>>, %arg9: memref<1x32xf32, #tpu.memory_space<vmem>>, %arg10: memref<32x128xbf16, #tpu.memory_space<vmem>>, %arg11: memref<1x128xf32, #tpu.memory_space<vmem>>, %arg12: memref<128x32xbf16, #tpu.memory_space<vmem>>, %arg13: memref<1x32xf32, #tpu.memory_space<vmem>>, %arg14: memref<1x8x32xf32, #tpu.memory_space<vmem>>) attributes {dimension_semantics = [#tpu.dimension_semantics<parallel>], iteration_bounds = array<i64: 2>, scalar_prefetch = 0 : i64, scratch_operands = 0 : i64, tpu.core_type = #tpu.core_type<tc>, window_params = [{transform_indices = @transform_0, window_bounds = array<i64: 1, 8, 32>}, {pipeline_mode = #tpu.pipeline_mode<synchronous>, transform_indices = @transform_1, window_bounds = array<i64: 1, 32>}, {pipeline_mode = #tpu.pipeline_mode<synchronous>, transform_indices = @transform_2, window_bounds = array<i64: 1, 32>}, {pipeline_mode = #tpu.pipeline_mode<synchronous>, transform_indices = @transform_3, window_bounds = array<i64: 32, 96>}, {pipeline_mode = #tpu.pipeline_mode<synchronous>, transform_indices = @transform_4, window_bounds = array<i64: 1, 96>}, {pipeline_mode = #tpu.pipeline_mode<synchronous>, transform_indices = @transform_5, window_bounds = array<i64: 32, 32>}, {pipeline_mode = #tpu.pipeline_mode<synchronous>, transform_indices = @transform_6, window_bounds = array<i64: 1, 32>}, {pipeline_mode = #tpu.pipeline_mode<synchronous>, transform_indices = @transform_7, window_bounds = array<i64: 1, 32>}, {pipeline_mode = #tpu.pipeline_mode<synchronous>, transform_indices = @transform_8, window_bounds = array<i64: 1, 32>}, {pipeline_mode = #tpu.pipeline_mode<synchronous>, transform_indices = @transform_9, window_bounds = array<i64: 32, 128>}, {pipeline_mode = #tpu.pipeline_mode<synchronous>, transform_indices = @transform_10, window_bounds = array<i64: 1, 128>}, {pipeline_mode = #tpu.pipeline_mode<synchronous>, transform_indices = @transform_11, window_bounds = array<i64: 128, 32>}, {pipeline_mode = #tpu.pipeline_mode<synchronous>, transform_indices = @transform_12, window_bounds = array<i64: 1, 32>}, {transform_indices = @transform_13, window_bounds = array<i64: 1, 8, 32>}]} {
    %c0 = arith.constant 0 : index
    %c0_0 = arith.constant 0 : index
    %c0_1 = arith.constant 0 : index
    %0 = vector.load %arg1[%c0, %c0_0, %c0_1] : memref<1x8x32xf32, #tpu.memory_space<vmem>>, vector<1x8x32xf32>
    %1 = vector.shape_cast %0 : vector<1x8x32xf32> to vector<8x32xf32>
    %cst = arith.constant dense<0.000000e+00> : vector<8xf32>
    %2 = vector.multi_reduction <add>, %1, %cst [1] : vector<8x32xf32> to vector<8xf32>
    %3 = vector.shape_cast %2 : vector<8xf32> to vector<8x1xf32>
    %cst_2 = arith.constant 3.200000e+01 : f32
    %4 = vector.broadcast %cst_2 : f32 to vector<8x1xf32>
    %5 = arith.divf %3, %4 : vector<8x1xf32>
    %6 = vector.broadcast %5 : vector<8x1xf32> to vector<8x32xf32>
    %7 = arith.subf %1, %6 : vector<8x32xf32>
    %8 = arith.mulf %7, %7 : vector<8x32xf32>
    %cst_3 = arith.constant dense<0.000000e+00> : vector<8xf32>
    %9 = vector.multi_reduction <add>, %8, %cst_3 [1] : vector<8x32xf32> to vector<8xf32>
    %10 = vector.shape_cast %9 : vector<8xf32> to vector<8x1xf32>
    %cst_4 = arith.constant 3.200000e+01 : f32
    %11 = vector.broadcast %cst_4 : f32 to vector<8x1xf32>
    %12 = arith.divf %10, %11 : vector<8x1xf32>
    %13 = vector.broadcast %5 : vector<8x1xf32> to vector<8x32xf32>
    %14 = arith.subf %1, %13 : vector<8x32xf32>
    %cst_5 = arith.constant 9.99999974E-6 : f32
    %15 = vector.broadcast %cst_5 : f32 to vector<8x1xf32>
    %16 = arith.addf %12, %15 : vector<8x1xf32>
    %17 = math.rsqrt %16 : vector<8x1xf32>
    %18 = vector.broadcast %17 : vector<8x1xf32> to vector<8x32xf32>
    %19 = arith.mulf %14, %18 : vector<8x32xf32>
    %c0_6 = arith.constant 0 : index
    %c0_7 = arith.constant 0 : index
    %20 = vector.load %arg2[%c0_6, %c0_7] : memref<1x32xf32, #tpu.memory_space<vmem>>, vector<1x32xf32>
    %21 = vector.broadcast %20 : vector<1x32xf32> to vector<8x32xf32>
    %22 = arith.mulf %19, %21 : vector<8x32xf32>
    %c0_8 = arith.constant 0 : index
    %c0_9 = arith.constant 0 : index
    %23 = vector.load %arg3[%c0_8, %c0_9] : memref<1x32xf32, #tpu.memory_space<vmem>>, vector<1x32xf32>
    %24 = vector.broadcast %23 : vector<1x32xf32> to vector<8x32xf32>
    %25 = arith.addf %22, %24 : vector<8x32xf32>
    %26 = arith.truncf %25 : vector<8x32xf32> to vector<8x32xbf16>
    %c0_10 = arith.constant 0 : index
    %c0_11 = arith.constant 0 : index
    %27 = vector.load %arg4[%c0_10, %c0_11] : memref<32x96xbf16, #tpu.memory_space<vmem>>, vector<32x96xbf16>
    %cst_12 = arith.constant dense<0.000000e+00> : vector<8x96xf32>
    %28 = tpu.matmul %26, %27, %cst_12 {dimension_numbers = #tpu.dot_dimension_numbers<[1], [0], [0], [1], [0, 0, 1, 1], [], []>} : vector<8x32xbf16>, vector<32x96xbf16>, vector<8x96xf32> -> vector<8x96xf32>
    %c0_13 = arith.constant 0 : index
    %c0_14 = arith.constant 0 : index
    %29 = vector.load %arg5[%c0_13, %c0_14] : memref<1x96xf32, #tpu.memory_space<vmem>>, vector<1x96xf32>
    %30 = vector.broadcast %29 : vector<1x96xf32> to vector<8x96xf32>
    %31 = arith.addf %28, %30 : vector<8x96xf32>
    %32 = vector.extract_strided_slice %31 {offsets = [0, 0], sizes = [8, 32], strides = [1, 1]} : vector<8x96xf32> to vector<8x32xf32>
    %33 = vector.extract_strided_slice %32 {offsets = [0, 0], sizes = [8, 8], strides = [1, 1]} : vector<8x32xf32> to vector<8x8xf32>
    %34 = vector.extract_strided_slice %32 {offsets = [0, 8], sizes = [8, 8], strides = [1, 1]} : vector<8x32xf32> to vector<8x8xf32>
    %35 = vector.extract_strided_slice %32 {offsets = [0, 16], sizes = [8, 8], strides = [1, 1]} : vector<8x32xf32> to vector<8x8xf32>
    %36 = vector.extract_strided_slice %32 {offsets = [0, 24], sizes = [8, 8], strides = [1, 1]} : vector<8x32xf32> to vector<8x8xf32>
    %37 = vector.shape_cast %33 : vector<8x8xf32> to vector<1x8x8xf32>
    %38 = vector.shape_cast %34 : vector<8x8xf32> to vector<1x8x8xf32>
    %39 = vector.shape_cast %35 : vector<8x8xf32> to vector<1x8x8xf32>
    %40 = vector.shape_cast %36 : vector<8x8xf32> to vector<1x8x8xf32>
    %41 = tpu.concatenate %37, %38, %39, %40 in 0 : vector<1x8x8xf32>, vector<1x8x8xf32>, vector<1x8x8xf32>, vector<1x8x8xf32> -> vector<4x8x8xf32>
    %cst_15 = arith.constant 0.353553385 : f32
    %42 = vector.broadcast %cst_15 : f32 to vector<4x8x8xf32>
    %43 = arith.mulf %41, %42 : vector<4x8x8xf32>
    %44 = vector.extract_strided_slice %31 {offsets = [0, 32], sizes = [8, 32], strides = [1, 1]} : vector<8x96xf32> to vector<8x32xf32>
    %45 = vector.extract_strided_slice %44 {offsets = [0, 0], sizes = [8, 8], strides = [1, 1]} : vector<8x32xf32> to vector<8x8xf32>
    %46 = vector.extract_strided_slice %44 {offsets = [0, 8], sizes = [8, 8], strides = [1, 1]} : vector<8x32xf32> to vector<8x8xf32>
    %47 = vector.extract_strided_slice %44 {offsets = [0, 16], sizes = [8, 8], strides = [1, 1]} : vector<8x32xf32> to vector<8x8xf32>
    %48 = vector.extract_strided_slice %44 {offsets = [0, 24], sizes = [8, 8], strides = [1, 1]} : vector<8x32xf32> to vector<8x8xf32>
    %49 = vector.shape_cast %45 : vector<8x8xf32> to vector<1x8x8xf32>
    %50 = vector.shape_cast %46 : vector<8x8xf32> to vector<1x8x8xf32>
    %51 = vector.shape_cast %47 : vector<8x8xf32> to vector<1x8x8xf32>
    %52 = vector.shape_cast %48 : vector<8x8xf32> to vector<1x8x8xf32>
    %53 = tpu.concatenate %49, %50, %51, %52 in 0 : vector<1x8x8xf32>, vector<1x8x8xf32>, vector<1x8x8xf32>, vector<1x8x8xf32> -> vector<4x8x8xf32>
    %54 = vector.extract_strided_slice %31 {offsets = [0, 64], sizes = [8, 32], strides = [1, 1]} : vector<8x96xf32> to vector<8x32xf32>
    %55 = vector.extract_strided_slice %54 {offsets = [0, 0], sizes = [8, 8], strides = [1, 1]} : vector<8x32xf32> to vector<8x8xf32>
    %56 = vector.extract_strided_slice %54 {offsets = [0, 8], sizes = [8, 8], strides = [1, 1]} : vector<8x32xf32> to vector<8x8xf32>
    %57 = vector.extract_strided_slice %54 {offsets = [0, 16], sizes = [8, 8], strides = [1, 1]} : vector<8x32xf32> to vector<8x8xf32>
    %58 = vector.extract_strided_slice %54 {offsets = [0, 24], sizes = [8, 8], strides = [1, 1]} : vector<8x32xf32> to vector<8x8xf32>
    %59 = vector.shape_cast %55 : vector<8x8xf32> to vector<1x8x8xf32>
    %60 = vector.shape_cast %56 : vector<8x8xf32> to vector<1x8x8xf32>
    %61 = vector.shape_cast %57 : vector<8x8xf32> to vector<1x8x8xf32>
    %62 = vector.shape_cast %58 : vector<8x8xf32> to vector<1x8x8xf32>
    %63 = tpu.concatenate %59, %60, %61, %62 in 0 : vector<1x8x8xf32>, vector<1x8x8xf32>, vector<1x8x8xf32>, vector<1x8x8xf32> -> vector<4x8x8xf32>
    %64 = tpu.iota {dimensions = array<i32: 0>} : vector<8x8xi32>
    %65 = tpu.iota {dimensions = array<i32: 1>} : vector<8x8xi32>
    %66 = arith.cmpi sge, %64, %65 : vector<8x8xi32>
    %cst_16 = arith.constant 0.000000e+00 : f32
    %cst_17 = arith.constant -1.000000e+30 : f32
    %67 = vector.broadcast %cst_16 : f32 to vector<8x8xf32>
    %68 = vector.broadcast %cst_17 : f32 to vector<8x8xf32>
    %69 = arith.select %66, %67, %68 : vector<8x8xi1>, vector<8x8xf32>
    %70 = arith.truncf %43 : vector<4x8x8xf32> to vector<4x8x8xbf16>
    %71 = arith.truncf %53 : vector<4x8x8xf32> to vector<4x8x8xbf16>
    "tpu.trace_start"() <{level = 10 : i32, message = "hqd,hkd->hqk"}> : () -> ()
    %cst_18 = arith.constant dense<0.000000e+00> : vector<4x8x8xf32>
    %72 = tpu.matmul %70, %71, %cst_18 {dimension_numbers = #tpu.dot_dimension_numbers<[2], [2], [1], [1], [0, 0, 0, 1, 1, 1], [0], [0]>} : vector<4x8x8xbf16>, vector<4x8x8xbf16>, vector<4x8x8xf32> -> vector<4x8x8xf32>
    "tpu.trace_stop"() : () -> ()
    %73 = vector.shape_cast %69 : vector<8x8xf32> to vector<1x8x8xf32>
    %74 = vector.broadcast %73 : vector<1x8x8xf32> to vector<4x8x8xf32>
    %75 = arith.addf %72, %74 : vector<4x8x8xf32>
    %cst_19 = arith.constant dense<0xFF800000> : vector<4x8xf32>
    %76 = vector.multi_reduction <maximumf>, %75, %cst_19 [2] : vector<4x8x8xf32> to vector<4x8xf32>
    %77 = vector.shape_cast %76 : vector<4x8xf32> to vector<4x8x1xf32>
    %78 = vector.broadcast %77 : vector<4x8x1xf32> to vector<4x8x8xf32>
    %79 = arith.subf %75, %78 : vector<4x8x8xf32>
    %80 = math.exp %79 : vector<4x8x8xf32>
    %cst_20 = arith.constant dense<0.000000e+00> : vector<4x8xf32>
    %81 = vector.multi_reduction <add>, %80, %cst_20 [2] : vector<4x8x8xf32> to vector<4x8xf32>
    %82 = vector.shape_cast %81 : vector<4x8xf32> to vector<4x8x1xf32>
    %83 = tpu.reciprocal %82 {approx = true} : vector<4x8x1xf32> -> vector<4x8x1xf32>
    %84 = vector.broadcast %83 : vector<4x8x1xf32> to vector<4x8x8xf32>
    %85 = arith.mulf %80, %84 : vector<4x8x8xf32>
    %86 = arith.truncf %85 : vector<4x8x8xf32> to vector<4x8x8xbf16>
    %87 = arith.truncf %63 : vector<4x8x8xf32> to vector<4x8x8xbf16>
    "tpu.trace_start"() <{level = 10 : i32, message = "hqk,hkd->hqd"}> : () -> ()
    %cst_21 = arith.constant dense<0.000000e+00> : vector<4x8x8xf32>
    %88 = tpu.matmul %86, %87, %cst_21 {dimension_numbers = #tpu.dot_dimension_numbers<[2], [1], [1], [2], [0, 0, 0, 1, 1, 2], [0], [0]>} : vector<4x8x8xbf16>, vector<4x8x8xbf16>, vector<4x8x8xf32> -> vector<4x8x8xf32>
    "tpu.trace_stop"() : () -> ()
    %89 = vector.extract_strided_slice %88 {offsets = [0, 0, 0], sizes = [1, 8, 8], strides = [1, 1, 1]} : vector<4x8x8xf32> to vector<1x8x8xf32>
    %90 = vector.shape_cast %89 : vector<1x8x8xf32> to vector<8x8xf32>
    %91 = vector.extract_strided_slice %88 {offsets = [1, 0, 0], sizes = [1, 8, 8], strides = [1, 1, 1]} : vector<4x8x8xf32> to vector<1x8x8xf32>
    %92 = vector.shape_cast %91 : vector<1x8x8xf32> to vector<8x8xf32>
    %93 = vector.extract_strided_slice %88 {offsets = [2, 0, 0], sizes = [1, 8, 8], strides = [1, 1, 1]} : vector<4x8x8xf32> to vector<1x8x8xf32>
    %94 = vector.shape_cast %93 : vector<1x8x8xf32> to vector<8x8xf32>
    %95 = vector.extract_strided_slice %88 {offsets = [3, 0, 0], sizes = [1, 8, 8], strides = [1, 1, 1]} : vector<4x8x8xf32> to vector<1x8x8xf32>
    %96 = vector.shape_cast %95 : vector<1x8x8xf32> to vector<8x8xf32>
    %97 = tpu.concatenate %90, %92, %94, %96 in 1 : vector<8x8xf32>, vector<8x8xf32>, vector<8x8xf32>, vector<8x8xf32> -> vector<8x32xf32>
    %98 = arith.truncf %97 : vector<8x32xf32> to vector<8x32xbf16>
    %c0_22 = arith.constant 0 : index
    %c0_23 = arith.constant 0 : index
    %99 = vector.load %arg6[%c0_22, %c0_23] : memref<32x32xbf16, #tpu.memory_space<vmem>>, vector<32x32xbf16>
    %cst_24 = arith.constant dense<0.000000e+00> : vector<8x32xf32>
    %100 = tpu.matmul %98, %99, %cst_24 {dimension_numbers = #tpu.dot_dimension_numbers<[1], [0], [0], [1], [0, 0, 1, 1], [], []>} : vector<8x32xbf16>, vector<32x32xbf16>, vector<8x32xf32> -> vector<8x32xf32>
    %c0_25 = arith.constant 0 : index
    %c0_26 = arith.constant 0 : index
    %101 = vector.load %arg7[%c0_25, %c0_26] : memref<1x32xf32, #tpu.memory_space<vmem>>, vector<1x32xf32>
    %102 = vector.broadcast %101 : vector<1x32xf32> to vector<8x32xf32>
    %103 = arith.addf %100, %102 : vector<8x32xf32>
    %104 = arith.addf %1, %103 : vector<8x32xf32>
    %cst_27 = arith.constant dense<0.000000e+00> : vector<8xf32>
    %105 = vector.multi_reduction <add>, %104, %cst_27 [1] : vector<8x32xf32> to vector<8xf32>
    %106 = vector.shape_cast %105 : vector<8xf32> to vector<8x1xf32>
    %cst_28 = arith.constant 3.200000e+01 : f32
    %107 = vector.broadcast %cst_28 : f32 to vector<8x1xf32>
    %108 = arith.divf %106, %107 : vector<8x1xf32>
    %109 = vector.broadcast %108 : vector<8x1xf32> to vector<8x32xf32>
    %110 = arith.subf %104, %109 : vector<8x32xf32>
    %111 = arith.mulf %110, %110 : vector<8x32xf32>
    %cst_29 = arith.constant dense<0.000000e+00> : vector<8xf32>
    %112 = vector.multi_reduction <add>, %111, %cst_29 [1] : vector<8x32xf32> to vector<8xf32>
    %113 = vector.shape_cast %112 : vector<8xf32> to vector<8x1xf32>
    %cst_30 = arith.constant 3.200000e+01 : f32
    %114 = vector.broadcast %cst_30 : f32 to vector<8x1xf32>
    %115 = arith.divf %113, %114 : vector<8x1xf32>
    %116 = vector.broadcast %108 : vector<8x1xf32> to vector<8x32xf32>
    %117 = arith.subf %104, %116 : vector<8x32xf32>
    %cst_31 = arith.constant 9.99999974E-6 : f32
    %118 = vector.broadcast %cst_31 : f32 to vector<8x1xf32>
    %119 = arith.addf %115, %118 : vector<8x1xf32>
    %120 = math.rsqrt %119 : vector<8x1xf32>
    %121 = vector.broadcast %120 : vector<8x1xf32> to vector<8x32xf32>
    %122 = arith.mulf %117, %121 : vector<8x32xf32>
    %c0_32 = arith.constant 0 : index
    %c0_33 = arith.constant 0 : index
    %123 = vector.load %arg8[%c0_32, %c0_33] : memref<1x32xf32, #tpu.memory_space<vmem>>, vector<1x32xf32>
    %124 = vector.broadcast %123 : vector<1x32xf32> to vector<8x32xf32>
    %125 = arith.mulf %122, %124 : vector<8x32xf32>
    %c0_34 = arith.constant 0 : index
    %c0_35 = arith.constant 0 : index
    %126 = vector.load %arg9[%c0_34, %c0_35] : memref<1x32xf32, #tpu.memory_space<vmem>>, vector<1x32xf32>
    %127 = vector.broadcast %126 : vector<1x32xf32> to vector<8x32xf32>
    %128 = arith.addf %125, %127 : vector<8x32xf32>
    %129 = arith.truncf %128 : vector<8x32xf32> to vector<8x32xbf16>
    %c0_36 = arith.constant 0 : index
    %c0_37 = arith.constant 0 : index
    %130 = vector.load %arg10[%c0_36, %c0_37] : memref<32x128xbf16, #tpu.memory_space<vmem>>, vector<32x128xbf16>
    %cst_38 = arith.constant dense<0.000000e+00> : vector<8x128xf32>
    %131 = tpu.matmul %129, %130, %cst_38 {dimension_numbers = #tpu.dot_dimension_numbers<[1], [0], [0], [1], [0, 0, 1, 1], [], []>} : vector<8x32xbf16>, vector<32x128xbf16>, vector<8x128xf32> -> vector<8x128xf32>
    %c0_39 = arith.constant 0 : index
    %c0_40 = arith.constant 0 : index
    %132 = vector.load %arg11[%c0_39, %c0_40] : memref<1x128xf32, #tpu.memory_space<vmem>>, vector<1x128xf32>
    %133 = vector.broadcast %132 : vector<1x128xf32> to vector<8x128xf32>
    %134 = arith.addf %131, %133 : vector<8x128xf32>
    %cst_41 = arith.constant 5.000000e-01 : f32
    %135 = vector.broadcast %cst_41 : f32 to vector<8x128xf32>
    %136 = arith.mulf %135, %134 : vector<8x128xf32>
    %137 = arith.mulf %134, %134 : vector<8x128xf32>
    %138 = arith.mulf %137, %134 : vector<8x128xf32>
    %cst_42 = arith.constant 4.471500e-02 : f32
    %139 = vector.broadcast %cst_42 : f32 to vector<8x128xf32>
    %140 = arith.mulf %139, %138 : vector<8x128xf32>
    %141 = arith.addf %134, %140 : vector<8x128xf32>
    %cst_43 = arith.constant 0.797884583 : f32
    %142 = vector.broadcast %cst_43 : f32 to vector<8x128xf32>
    %143 = arith.mulf %142, %141 : vector<8x128xf32>
    %144 = math.tanh %143 : vector<8x128xf32>
    %cst_44 = arith.constant 1.000000e+00 : f32
    %145 = vector.broadcast %cst_44 : f32 to vector<8x128xf32>
    %146 = arith.addf %145, %144 : vector<8x128xf32>
    %147 = arith.mulf %136, %146 : vector<8x128xf32>
    %148 = arith.truncf %147 : vector<8x128xf32> to vector<8x128xbf16>
    %c0_45 = arith.constant 0 : index
    %c0_46 = arith.constant 0 : index
    %149 = vector.load %arg12[%c0_45, %c0_46] : memref<128x32xbf16, #tpu.memory_space<vmem>>, vector<128x32xbf16>
    %cst_47 = arith.constant dense<0.000000e+00> : vector<8x32xf32>
    %150 = tpu.matmul %148, %149, %cst_47 {dimension_numbers = #tpu.dot_dimension_numbers<[1], [0], [0], [1], [0, 0, 1, 1], [], []>} : vector<8x128xbf16>, vector<128x32xbf16>, vector<8x32xf32> -> vector<8x32xf32>
    %c0_48 = arith.constant 0 : index
    %c0_49 = arith.constant 0 : index
    %151 = vector.load %arg13[%c0_48, %c0_49] : memref<1x32xf32, #tpu.memory_space<vmem>>, vector<1x32xf32>
    %152 = vector.broadcast %151 : vector<1x32xf32> to vector<8x32xf32>
    %153 = arith.addf %150, %152 : vector<8x32xf32>
    %154 = arith.addf %104, %153 : vector<8x32xf32>
    %c0_50 = arith.constant 0 : index
    %c0_51 = arith.constant 0 : index
    %c0_52 = arith.constant 0 : index
    %155 = vector.load %arg14[%c0_50, %c0_51, %c0_52] : memref<1x8x32xf32, #tpu.memory_space<vmem>>, vector<1x8x32xf32>
    %156 = vector.shape_cast %155 : vector<1x8x32xf32> to vector<8x32xf32>
    %157 = vector.shape_cast %154 : vector<8x32xf32> to vector<1x8x32xf32>
    tpu.vector_store %arg14[%c0_50, %c0_51, %c0_52], %157 {strides = array<i32>} : memref<1x8x32xf32, #tpu.memory_space<vmem>>, vector<1x8x32xf32>,
    return
  }
  func.func @transform_0(%arg0: i32) -> (i32, i32, i32) {
    %c0_i32 = arith.constant 0 : i32
    %c0_i32_0 = arith.constant 0 : i32
    %c0_i32_1 = arith.constant 0 : i32
    return %arg0, %c0_i32, %c0_i32_0 : i32, i32, i32
  }
  func.func @transform_1(%arg0: i32) -> (i32, i32) {
    %c0_i32 = arith.constant 0 : i32
    %c0_i32_0 = arith.constant 0 : i32
    %c0_i32_1 = arith.constant 0 : i32
    return %c0_i32, %c0_i32_0 : i32, i32
  }
  func.func @transform_2(%arg0: i32) -> (i32, i32) {
    %c0_i32 = arith.constant 0 : i32
    %c0_i32_0 = arith.constant 0 : i32
    %c0_i32_1 = arith.constant 0 : i32
    return %c0_i32, %c0_i32_0 : i32, i32
  }
  func.func @transform_3(%arg0: i32) -> (i32, i32) {
    %c0_i32 = arith.constant 0 : i32
    %c0_i32_0 = arith.constant 0 : i32
    %c0_i32_1 = arith.constant 0 : i32
    return %c0_i32, %c0_i32_0 : i32, i32
  }
  func.func @transform_4(%arg0: i32) -> (i32, i32) {
    %c0_i32 = arith.constant 0 : i32
    %c0_i32_0 = arith.constant 0 : i32
    %c0_i32_1 = arith.constant 0 : i32
    return %c0_i32, %c0_i32_0 : i32, i32
  }
  func.func @transform_5(%arg0: i32) -> (i32, i32) {
    %c0_i32 = arith.constant 0 : i32
    %c0_i32_0 = arith.constant 0 : i32
    %c0_i32_1 = arith.constant 0 : i32
    return %c0_i32, %c0_i32_0 : i32, i32
  }
  func.func @transform_6(%arg0: i32) -> (i32, i32) {
    %c0_i32 = arith.constant 0 : i32
    %c0_i32_0 = arith.constant 0 : i32
    %c0_i32_1 = arith.constant 0 : i32
    return %c0_i32, %c0_i32_0 : i32, i32
  }
  func.func @transform_7(%arg0: i32) -> (i32, i32) {
    %c0_i32 = arith.constant 0 : i32
    %c0_i32_0 = arith.constant 0 : i32
    %c0_i32_1 = arith.constant 0 : i32
    return %c0_i32, %c0_i32_0 : i32, i32
  }
  func.func @transform_8(%arg0: i32) -> (i32, i32) {
    %c0_i32 = arith.constant 0 : i32
    %c0_i32_0 = arith.constant 0 : i32
    %c0_i32_1 = arith.constant 0 : i32
    return %c0_i32, %c0_i32_0 : i32, i32
  }
  func.func @transform_9(%arg0: i32) -> (i32, i32) {
    %c0_i32 = arith.constant 0 : i32
    %c0_i32_0 = arith.constant 0 : i32
    %c0_i32_1 = arith.constant 0 : i32
    return %c0_i32, %c0_i32_0 : i32, i32
  }
  func.func @transform_10(%arg0: i32) -> (i32, i32) {
    %c0_i32 = arith.constant 0 : i32
    %c0_i32_0 = arith.constant 0 : i32
    %c0_i32_1 = arith.constant 0 : i32
    return %c0_i32, %c0_i32_0 : i32, i32
  }
  func.func @transform_11(%arg0: i32) -> (i32, i32) {
    %c0_i32 = arith.constant 0 : i32
    %c0_i32_0 = arith.constant 0 : i32
    %c0_i32_1 = arith.constant 0 : i32
    return %c0_i32, %c0_i32_0 : i32, i32
  }
  func.func @transform_12(%arg0: i32) -> (i32, i32) {
    %c0_i32 = arith.constant 0 : i32
    %c0_i32_0 = arith.constant 0 : i32
    %c0_i32_1 = arith.constant 0 : i32
    return %c0_i32, %c0_i32_0 : i32, i32
  }
  func.func @transform_13(%arg0: i32) -> (i32, i32, i32) {
    %c0_i32 = arith.constant 0 : i32
    %c0_i32_0 = arith.constant 0 : i32
    %c0_i32_1 = arith.constant 0 : i32
    return %arg0, %c0_i32, %c0_i32_0 : i32, i32, i32
  }
}

</mosaic_0001>

<bundles_post_ra>
// kernel: tpu_custom_call.1
= control target key start
LH: loop header
LB: loop body
LE: loop exit
PB: predicated region body
PF: predicated region fallthrough
CT: control target
= control target key end

     0   :  { %s2055_s0 = inlined_call_operand.vmem [shape: f32[2,8,32], index: 0, kind: input, shape index: {}]   ;;  %s2056_s1 = inlined_call_operand.vmem [shape: f32[1,32], index: 1, kind: input, shape index: {}]   ;;  %s2057_s2 = inlined_call_operand.vmem [shape: f32[1,32], index: 2, kind: input, shape index: {}]   ;;  %s2058_s3 = inlined_call_operand.vmem [shape: bf16[32,96], index: 3, kind: input, shape index: {}]   ;;  %s2059_s4 = inlined_call_operand.vmem [shape: f32[1,96], index: 4, kind: input, shape index: {}]   ;;  %s2060_s5 = inlined_call_operand.vmem [shape: bf16[32,32], index: 5, kind: input, shape index: {}]   ;;  %s2061_s6 = inlined_call_operand.vmem [shape: f32[1,32], index: 6, kind: input, shape index: {}]   ;;  %s2062_s7 = inlined_call_operand.vmem [shape: f32[1,32], index: 7, kind: input, shape index: {}]   ;;  %s2063_s8 = inlined_call_operand.vmem [shape: f32[1,32], index: 8, kind: input, shape index: {}]   ;;  %s2064_s9 = inlined_call_operand.vmem [shape: bf16[32,128], index: 9, kind: input, shape index: {}]   ;;  %s2065_s10 = inlined_call_operand.vmem [shape: f32[1,128], index: 10, kind: input, shape index: {}]   ;;  %s2066_s11 = inlined_call_operand.vmem [shape: bf16[128,32], index: 11, kind: input, shape index: {}]   ;;  %s2067_s12 = inlined_call_operand.vmem [shape: f32[1,32], index: 12, kind: input, shape index: {}]   ;;  %s2068_s13 = inlined_call_operand.hbm [shape: f32[2,8,32], index: 13, kind: output, shape index: {}]  }
   0x1   :  { %2069 = sst [smem:[#allocation5_spill]] %s2055_s0 }
   0x2   :  { %2070 = sst [smem:[#allocation6_spill]] %s2056_s1 }
   0x3   :  { %2071 = sst [smem:[#allocation7_spill]] %s2057_s2 }
   0x4   :  { %18 = vsyncpa [#allocation3], 0 }
   0x5   :  { %20 = vsyncpa [#allocation3 + $0x1], 0  ;;  %s1780_s25 = smov 0   ;;  %s1782_s26 = smov 0  }
   0x6   :  { %s1784_s27 = smov 0   ;;  %s1786_s28 = smov 0  }
   0x7 LB: > { %s1801_s29 = sadd.s32 4294967295, %s1696_s28   ;;  %s1379_s30 = sadd.s32 4294967294, %s1696_s28   ;;  %s1696_s28 = sphi %s1786_s28, %s2080_s28   ;;  %s1692_s27 = sphi %s1784_s27, %s2079_s27   ;;  %s1688_s26 = sphi %s1782_s26, %s2078_s26   ;;  %s1684_s25 = sphi %s1780_s25, %s2077_s25  }
   0x8   : > { %s1805_s14 = sadd.s32 1, %s1696_s28   ;;  %s311_s15 = sadd.s32 1, %s1692_s27 }
   0x9   : > { %s308_s16 = ssub.s32 %s1696_s28, %s1805_s14  ;;  %p321_p0 = scmp.ne.s32.totalorder %s1692_s27, %s1688_s26 }
   0xa   : > { %p309_p1 = scmp.eq.s32.totalorder %s308_s16, 0  ;;  %p322_p2 = scmp.eq.s32.totalorder %s1801_s29, 1 }
   0xb   : > { %p327_p3 = scmp.ne.s32.totalorder %s1688_s26, %s1684_s25  ;;  %p328_p4 = scmp.eq.s32.totalorder %s1379_s30, 1 }
   0xc   : > { %s1816_s17 = scalar_select %p309_p1, %s1692_s27, %s311_s15  }
   0xd   : > { %p1818_p5 = por %p322_p2, %p321_p0  ;;  %p1822_p6 = por %p328_p4, %p327_p3 }
   0xe   : > { %p1382_p7 = scmp.ge.s32.totalorder %s1696_s28, 1  ;;  %p389_p8 = scmp.lt.s32.totalorder %s1696_s28, 3 }
  0x10   : > { %p390_p9 = pnand %p1382_p7, %p389_p8 }
  0x11   : > { %p432_p10 = scmp.lt.s32.totalorder (!%p390_p9), %s1801_s29, 1  ;;  %vm438_vm0 = vcmask (!%p390_p9), 261120   ;;  %s2074_s0 = sld [smem:[#allocation5_spill]] (!%p390_p9)  ;;  %v1598_v7 = vld [vmem:[%s2058_s3] sm:$0xff] (!%p390_p9)   ;;  %v1698_v8 = vmov (!%p390_p9), 0.0   ;;  %vm1699_vm1 = vmmov (!%p390_p9), 0   ;;  %v550_v49 = vlaneseq (!%p390_p9) }
  0x12   : > { %393 = sbr.rel (%p390_p9) target bundleno = 2670 (0xa6e), region = 72  ;;  %1456 = vmatprep.subr.bf16.mxu0 (!%p390_p9), %v1698_v8  ;;  %1460 = vmatprep.mubr.msk.bf16.mxu0 (!%p390_p9), %vm1699_vm1, %v1698_v8  ;;  %v1599_v9 = vld [vmem:[%s2058_s3 + $0x8] sm:$0xff] (!%p390_p9)   ;;  %s2075_s1 = sld [smem:[#allocation6_spill]] (!%p390_p9)  ;;  %v1387_v20 = vld [vmem:[%s2059_s4] ss:$0 sm:$0xff] (!%p390_p9)  ;;  %vm567_vm2 = vcmask (!%p390_p9), 64512  }
  0x13   : > { %1457 = vmatpush3.bf16.msra.mxu0 (!%p390_p9), %v1598_v7  ;;  %1476 = vmatprep.subr.bf16.mxu1 (!%p390_p9), %v1698_v8  ;;  %s2076_s2 = sld [smem:[#allocation7_spill]] (!%p390_p9)  ;;  %s1700_s16 = smov (!%p390_p9), 104   ;;  %v551_v50 = vshrl.u32 (!%p390_p9), %v550_v49, 7  ;;  %v553_v51 = vand.u32 (!%p390_p9), 127, %v550_v49  ;;  %v1704_v52 = vmov (!%p390_p9), -1e+30  }
  0x14   : > { %1458 = vmatprep.subr.bf16.mxu0 (!%p390_p9), %v1698_v8  ;;  %1478 = vmatprep.mubr.msk.bf16.mxu1 (!%p390_p9), %vm1699_vm1, %v1698_v8  ;;  %s1703_s22 = smov (!%p390_p9), 96   ;;  %s1705_s23 = smov (!%p390_p9), 64   ;;  %vm814_vm4 = vcmask (!%p390_p9), 1043456   ;;  %vm1015_vm5 = vcmask (!%p390_p9), 130048   ;;  %vm1017_vm6 = vcmask (!%p390_p9), 195584  }
  0x15   : > { %vm554_vm3 = vcmp.ge.s32.totalorder (!%p390_p9), %v551_v50, %v553_v51 }
  0x16   : > { %v555_v53 = vsel (!%p390_p9), %vm554_vm3, 0.0, %v1704_v52 }
  0x17   : > { %1459 = vmatpush3.bf16.msra.mxu0 (!%p390_p9), %v1599_v9 }
  0x18   : > { %1464 = vmatprep.subr.bf16.mxu0 (!%p390_p9), %v1698_v8  ;;  %v1385_v14 = vld [vmem:[%s2075_s1] ss:$0 sm:$0xff] (!%p390_p9) }
  0x19   : > { %s433_s20 = scalar_select %p432_p10, %s1801_s29, 1  ;;  %v1386_v16 = vld [vmem:[%s2076_s2] ss:$0 sm:$0xff] }
  0x1b   : > { %s1384_s21 = sshll.u32 %s433_s20, 3  ;;  %s1701_s20 = smov 120  }
  0x1c   : > { %s435_s24 = scalar_lea.vmem %s2074_s0, %s1384_s21  ;;  %s1702_s21 = smov 112  }
  0x1d   : > { %v1833_v0 = vld [vmem:[%s435_s24] sm:$0xff] }
  0x1e   : > { %v439_v1 = vsel %vm438_vm0, %v1833_v0, 0.0 }
  0x1f   : > { %440 = vadd.xlane.f32.xlu0 %v439_v1 }
  0xac   : > { %v441_v2 = vpop.xlane.xlu0 %440 }
  0xad   : > { %v443_v3 = vmul.f32 0.03125, %v441_v2 }
  0xaf   : > { %v444_v4 = vsub.f32 %v1833_v0, %v443_v3 }
  0xb1   : > { %v445_v5 = vmul.f32 %v444_v4, %v444_v4 }
  0xb3   : > { %v446_v6 = vsel %vm438_vm0, %v445_v5, 0.0 }
  0xb4   : > { %447 = vadd.xlane.f32.xlu0 %v446_v6 }
 0x141   : > { %v448_v10 = vpop.xlane.xlu0 %447 }
 0x142   : > { %v449_v11 = vmul.f32 0.03125, %v448_v10 }
 0x144   : > { %v450_v12 = vadd.f32 1e-05, %v449_v11 }
 0x146   : > { %1612 = vrsqrt.f32 %v450_v12 }
 0x150   : > { %v1613_v13 = vpop.eup %1612 }
 0x151   : > { %v452_v15 = vmul.f32 %v1613_v13, %v444_v4 }
 0x153   : > { %v460_v17 = vmul.f32 %v1385_v14, %v452_v15 }
 0x155   : > { %v468_v18 = vadd.f32 %v1386_v16, %v460_v17 }
 0x157   : > { %v469_v19 = vpack.c.bf16 %v468_v18, %v468_v18 }
 0x159   : > { %1461 = vmatmul.mubr.msk.bf16.vlgmr.msra.gmra.mrb[0].mxu0 %vm438_vm0, %v469_v19 }
 0x15a   : > { %1466 = vmatprep.mubr.msk.bf16.mxu0 %vm1699_vm1, %v1698_v8 }
 0x22c   : > { %v530_v21 = vpop.f32.mrb[0].mxu0 }
 0x22d   : > { %v531_v22 = vadd.f32 %v1387_v20, %v530_v21  ;;  %v1462_v23 = vpop.f32.mrb[1].mxu0 }
 0x22e   : > { %v533_v24 = vpop.f32.mrb[2].mxu0 }
 0x22f   : > { %543 = vrot.lane.b32.xlu0 %v531_v22, %s1700_s16  ;;  %537 = vrot.lane.b32.xlu1 %v531_v22, %s1701_s20  ;;  %v1463_v25 = vpop.f32.mrb[3].mxu0  ;;  %v1865_v26 = vpack.c.bf16 %v531_v22, %v531_v22  ;;  %v546_v35 = vmul.f32 0.35355338, %v531_v22  ;;  %s1706_s20 = smov 8   ;;  %s429_s16 = sand.u32 1, %s1688_s26  }
 0x231   : > { %v556_v36 = vpack.c.bf16 %v546_v35, %v546_v35 }
 0x233   : > { %540 = vrot.lane.b32.xlu1 %v531_v22, %s1702_s21  ;;  %s1707_s21 = smov 16  }
 0x237   : > { %565 = vrot.lane.b32.xlu1 %v1865_v26, %s1703_s22 }
 0x2a1   : > { %v538_v27 = vpop.permute.xlu1 %537  ;;  %v544_v31 = vpop.permute.xlu0 %543 }
 0x2a2   : > { %v1868_v28 = vpack.c.bf16 %v538_v27, %v538_v27  ;;  %v1874_v33 = vpack.c.bf16 %v544_v31, %v544_v31  ;;  %v547_v39 = vmul.f32 0.35355338, %v538_v27  ;;  %v549_v46 = vmul.f32 0.35355338, %v544_v31 }
 0x2a4   : > { %615 = vrot.lane.b32.xlu1 %v1868_v28, %s1703_s22  ;;  %v557_v42 = vpack.c.bf16 %v547_v39, %v547_v39  ;;  %v559_v48 = vpack.c.bf16 %v549_v46, %v549_v46 }
 0x2a5   : > { %v541_v29 = vpop.permute.xlu1 %540 }
 0x2a6   : > { %v1871_v30 = vpack.c.bf16 %v541_v29, %v541_v29  ;;  %v548_v43 = vmul.f32 0.35355338, %v541_v29 }
 0x2a8   : > { %664 = vrot.lane.b32.xlu1 %v1871_v30, %s1703_s22  ;;  %v558_v47 = vpack.c.bf16 %v548_v43, %v548_v43 }
 0x2a9   : > { %v566_v32 = vpop.permute.xlu1 %565 }
 0x2aa   : > { %v572_v34 = vsel %vm567_vm2, %v566_v32, 0 }
 0x2ab   : > { %1465 = vmatpush3.bf16.xpose.msra.mxu0 %v572_v34 }
 0x2ac   : > { %713 = vrot.lane.b32.xlu1 %v1874_v33, %s1703_s22  ;;  %1470 = vmatprep.subr.bf16.mxu0 %v1698_v8  ;;  %s1708_s22 = smov 24  }
 0x2b2   : > { %1467 = vmatmul.mubr.msk.bf16.vlgmr.msra.gmra.mrb[4].mxu0 %vm567_vm2, %v556_v36 }
 0x2b3   : > { %1472 = vmatprep.mubr.msk.bf16.mxu0 %vm1699_vm1, %v1698_v8 }
 0x316   : > { %v616_v37 = vpop.permute.xlu1 %615 }
 0x317   : > { %v621_v38 = vsel %vm567_vm2, %v616_v37, 0 }
 0x318   : > { %1471 = vmatpush3.bf16.xpose.msra.mxu0 %v621_v38 }
 0x319   : > { %1482 = vmatprep.subr.bf16.mxu0 %v1698_v8 }
 0x31a   : > { %v665_v40 = vpop.permute.xlu1 %664 }
 0x31b   : > { %v670_v41 = vsel %vm567_vm2, %v665_v40, 0 }
 0x31c   : > { %1477 = vmatpush3.bf16.xpose.msra.mxu1 %v670_v41 }
 0x31d   : > { %1488 = vmatprep.subr.bf16.mxu1 %v1698_v8 }
 0x31e   : > { %v714_v44 = vpop.permute.xlu1 %713 }
 0x31f   : > { %v719_v45 = vsel %vm567_vm2, %v714_v44, 0  ;;  %1473 = vmatmul.mubr.msk.bf16.vlgmr.msra.gmra.mrb[8].mxu0 %vm567_vm2, %v557_v42 }
 0x320   : > { %1483 = vmatpush3.bf16.xpose.msra.mxu0 %v719_v45  ;;  %1484 = vmatprep.mubr.msk.bf16.mxu0 %vm1699_vm1, %v1698_v8 }
 0x321   : > { %1494 = vmatprep.subr.bf16.mxu0 %v1698_v8 }
 0x323   : > { %1479 = vmatmul.mubr.msk.bf16.vlgmr.msra.gmra.mrb[0].mxu1 %vm567_vm2, %v558_v47 }
 0x324   : > { %1490 = vmatprep.mubr.msk.bf16.mxu1 %vm1699_vm1, %v1698_v8 }
 0x327   : > { %1485 = vmatmul.mubr.msk.bf16.vlgmr.msra.gmra.mrb[12].mxu0 %vm567_vm2, %v559_v48 }
 0x328   : > { %1496 = vmatprep.mubr.msk.bf16.mxu0 %vm1699_vm1, %v1698_v8 }
 0x385   : > { %v608_v54 = vpop.f32.mrb[4].mxu0 }
 0x386   : > { %v609_v55 = vadd.f32 %v608_v54, %v555_v53  ;;  %v1468_v56 = vpop.f32.mrb[5].mxu0 }
 0x387   : > { %v611_v57 = vpop.f32.mrb[6].mxu0 }
 0x388   : > { %v1469_v58 = vpop.f32.mrb[7].mxu0  ;;  %v761_v59 = vsel %vm567_vm2, %v609_v55, -inf }
 0x389   : > { %762 = vmax.xlane.f32.xlu1 %v761_v59 }
 0x3f2   : > { %v657_v60 = vpop.f32.mrb[8].mxu0 }
 0x3f3   : > { %v658_v61 = vadd.f32 %v657_v60, %v555_v53  ;;  %v1474_v62 = vpop.f32.mrb[9].mxu0 }
 0x3f4   : > { %v660_v63 = vpop.f32.mrb[10].mxu0 }
 0x3f5   : > { %v1475_v1 = vpop.f32.mrb[11].mxu0  ;;  %v764_v2 = vsel %vm567_vm2, %v658_v61, -inf }
 0x3f6   : > { %v706_v3 = vpop.f32.mrb[0].mxu1  ;;  %765 = vmax.xlane.f32.xlu0 %v764_v2  ;;  %v1600_v1 = vld [vmem:[%s2060_s5] sm:$0xff]   ;;  %v1601_v2 = vld [vmem:[%s2060_s5 + $0x8] sm:$0xff]  }
 0x3f7   : > { %v707_v4 = vadd.f32 %v706_v3, %v555_v53  ;;  %v1480_v5 = vpop.f32.mrb[1].mxu1 }
 0x3f8   : > { %v709_v6 = vpop.f32.mrb[2].mxu1 }
 0x3f9   : > { %v1481_v7 = vpop.f32.mrb[3].mxu1  ;;  %v767_v9 = vsel %vm567_vm2, %v707_v4, -inf }
 0x3fa   : > { %768 = vmax.xlane.f32.xlu1 %v767_v9  ;;  %v755_v10 = vpop.f32.mrb[12].mxu0 }
 0x3fb   : > { %v756_v11 = vadd.f32 %v755_v10, %v555_v53  ;;  %v1486_v12 = vpop.f32.mrb[13].mxu0 }
 0x3fc   : > { %v758_v13 = vpop.f32.mrb[14].mxu0 }
 0x3fd   : > { %v1487_v14 = vpop.f32.mrb[15].mxu0  ;;  %v770_v15 = vsel %vm567_vm2, %v756_v11, -inf }
 0x3fe   : > { %771 = vmax.xlane.f32.xlu0 %v770_v15 }
 0x40b   : > { %809 = vrot.lane.b32.xlu1 %v1865_v26, %s1705_s23 }
 0x416   : > { %v763_v16 = vpop.xlane.xlu1 %762 }
 0x417   : > { %v773_v17 = vsub.f32 %v609_v55, %v763_v16 }
 0x419   : > { %v777_v18 = vmul.f32 1.442695, %v773_v17 }
 0x41b   : > { %1614 = vpow2.f32 %v777_v18 }
 0x425   : > { %v1615_v19 = vpop.eup %1614 }
 0x426   : > { %v785_v20 = vsel %vm567_vm2, %v1615_v19, 0.0 }
 0x42f   : > { %786 = vadd.xlane.f32.xlu1 %v785_v20 }
 0x483   : > { %v766_v21 = vpop.xlane.xlu0 %765 }
 0x484   : > { %v774_v22 = vsub.f32 %v658_v61, %v766_v21 }
 0x486   : > { %v779_v23 = vmul.f32 1.442695, %v774_v22 }
 0x487   : > { %v769_v24 = vpop.xlane.xlu1 %768 }
 0x488   : > { %1616 = vpow2.f32 %v779_v23  ;;  %v775_v25 = vsub.f32 %v707_v4, %v769_v24  ;;  %v1399_v23 = vld [vmem:[%s2061_s6] ss:$0 sm:$0xff] }
 0x48a   : > { %v781_v27 = vmul.f32 1.442695, %v775_v25 }
 0x48b   : > { %v810_v29 = vpop.permute.xlu1 %809  ;;  %v772_v31 = vpop.xlane.xlu0 %771 }
 0x48c   : > { %1618 = vpow2.f32 %v781_v27  ;;  %v816_v26 = vsel %vm814_vm4, %v810_v29, 0  ;;  %v776_v32 = vsub.f32 %v756_v11, %v772_v31 }
 0x48d   : > { %1489 = vmatpush3.bf16.msra.mxu1 %v816_v26 }
 0x48e   : > { %v783_v34 = vmul.f32 1.442695, %v776_v32  ;;  %1500 = vmatprep.subr.bf16.mxu1 %v1698_v8 }
 0x490   : > { %1620 = vpow2.f32 %v783_v34 }
 0x492   : > { %v1617_v35 = vpop.eup %1616 }
 0x493   : > { %v788_v36 = vsel %vm567_vm2, %v1617_v35, 0.0 }
 0x494   : > { %789 = vadd.xlane.f32.xlu0 %v788_v36 }
 0x496   : > { %v1619_v37 = vpop.eup %1618 }
 0x497   : > { %v791_v38 = vsel %vm567_vm2, %v1619_v37, 0.0 }
 0x498   : > { %792 = vadd.xlane.f32.xlu1 %v791_v38 }
 0x49a   : > { %v1621_v39 = vpop.eup %1620 }
 0x49b   : > { %v794_v40 = vsel %vm567_vm2, %v1621_v39, 0.0 }
 0x49c   : > { %795 = vadd.xlane.f32.xlu0 %v794_v40  ;;  %v1604_v40 = vld [vmem:[%s2066_s11] sm:$0xff]  }
 0x4a9   : > { %906 = vrot.lane.b32.xlu1 %v1871_v30, %s1705_s23 }
 0x4ad   : > { %954 = vrot.lane.b32.xlu1 %v1874_v33, %s1705_s23 }
 0x4b2   : > { %858 = vrot.lane.b32.xlu0 %v1868_v28, %s1705_s23  ;;  %s1419_s23 = sshll.u32 %s1801_s29, 7  ;;  %s1307_s29 = scalar_lea.sflag [#allocation3], %s429_s16 }
 0x4b3   : > { %s2012_s1 = scalar_lea.hbm %s2068_s13, %s1419_s23 }
 0x4bc   : > { %v787_v41 = vpop.xlane.xlu1 %786 }
 0x4bd   : > { %1622 = vrcp.f32 %v787_v41 }
 0x4c7   : > { %v1623_v42 = vpop.eup %1622 }
 0x4c8   : > { %v801_v43 = vmul.f32 %v1623_v42, %v1615_v19 }
 0x4ca   : > { %v805_v44 = vpack.c.bf16 %v801_v43, %v801_v43 }
 0x4cc   : > { %1491 = vmatmul.mubr.msk.bf16.vlgmr.msra.gmra.mrb[4].mxu1 %vm567_vm2, %v805_v44 }
 0x4cd   : > { %1502 = vmatprep.mubr.msk.bf16.mxu1 %vm1699_vm1, %v1698_v8 }
 0x521   : > { %v790_v45 = vpop.xlane.xlu0 %789 }
 0x522   : > { %1624 = vrcp.f32 %v790_v45  ;;  %v1403_v45 = vld [vmem:[%s2062_s7] ss:$0 sm:$0xff] }
 0x525   : > { %v793_v46 = vpop.xlane.xlu1 %792 }
 0x526   : > { %1626 = vrcp.f32 %v793_v46 }
 0x529   : > { %v907_v30 = vpop.permute.xlu1 %906  ;;  %v796_v47 = vpop.xlane.xlu0 %795 }
 0x52a   : > { %v912_v33 = vsel %vm814_vm4, %v907_v30, 0  ;;  %1628 = vrcp.f32 %v796_v47  ;;  %v1404_v30 = vld [vmem:[%s2063_s8] ss:$0 sm:$0xff] }
 0x52b   : > { %1501 = vmatpush3.bf16.msra.mxu1 %v912_v33 }
 0x52c   : > { %v1625_v28 = vpop.eup %1624  ;;  %1512 = vmatprep.subr.bf16.mxu1 %v1698_v8 }
 0x52d   : > { %v802_v48 = vmul.f32 %v1625_v28, %v1617_v35  ;;  %v859_v49 = vpop.permute.xlu0 %858  ;;  %v955_v51 = vpop.permute.xlu1 %954 }
 0x52e   : > { %v864_v50 = vsel %vm814_vm4, %v859_v49, 0  ;;  %v960_v55 = vsel %vm814_vm4, %v955_v51, 0  ;;  %v1606_v49 = vld [vmem:[%s2066_s11 + $0x10] sm:$0xff]   ;;  %v1608_v51 = vld [vmem:[%s2066_s11 + $0x20] sm:$0xff]  }
 0x52f   : > { %1495 = vmatpush3.bf16.msra.mxu0 %v864_v50  ;;  %v806_v52 = vpack.c.bf16 %v802_v48, %v802_v48  ;;  %v1605_v48 = vld [vmem:[%s2066_s11 + $0x8] sm:$0xff]   ;;  %v1607_v50 = vld [vmem:[%s2066_s11 + $0x18] sm:$0xff]  }
 0x530   : > { %v1627_v53 = vpop.eup %1626  ;;  %1506 = vmatprep.subr.bf16.mxu0 %v1698_v8 }
 0x531   : > { %v803_v54 = vmul.f32 %v1627_v53, %v1619_v37  ;;  %v1610_v53 = vld [vmem:[%s2066_s11 + $0x30] sm:$0xff]  }
 0x532   : > { %1497 = vmatmul.mubr.msk.bf16.vlgmr.msra.gmra.mrb[16].mxu0 %vm567_vm2, %v806_v52  ;;  %v1609_v52 = vld [vmem:[%s2066_s11 + $0x28] sm:$0xff]  }
 0x533   : > { %1507 = vmatpush3.bf16.msra.mxu0 %v960_v55  ;;  %v807_v56 = vpack.c.bf16 %v803_v54, %v803_v54  ;;  %1508 = vmatprep.mubr.msk.bf16.mxu0 %vm1699_vm1, %v1698_v8  ;;  %v1611_v54 = vld [vmem:[%s2066_s11 + $0x38] sm:$0xff]   ;;  %v1405_v55 = vld [vmem:[%s2065_s10] ss:$0 sm:$0xff] }
 0x534   : > { %v1629_v57 = vpop.eup %1628  ;;  %1520 = vmatprep.subr.bf16.mxu0 %v1698_v8 }
 0x535   : > { %v804_v58 = vmul.f32 %v1629_v57, %v1621_v39  ;;  %1503 = vmatmul.mubr.msk.bf16.vlgmr.msra.gmra.mrb[8].mxu1 %vm567_vm2, %v807_v56  ;;  %v1602_v39 = vld [vmem:[%s2064_s9] sm:$0xff]  }
 0x536   : > { %1516 = vmatprep.mubr.msk.bf16.mxu1 %vm1699_vm1, %v1698_v8  ;;  %1513 = vmatpush3.bf16.msra.mxu1 %v1600_v1 }
 0x537   : > { %v808_v59 = vpack.c.bf16 %v804_v58, %v804_v58  ;;  %1514 = vmatprep.subr.bf16.mxu1 %v1698_v8 }
 0x53a   : > { %1509 = vmatmul.mubr.msk.bf16.vlgmr.msra.gmra.mrb[20].mxu0 %vm567_vm2, %v808_v59  ;;  %1515 = vmatpush3.bf16.msra.mxu1 %v1601_v2 }
 0x53b   : > { %1524 = vmatprep.mubr.msk.bf16.mxu0 %vm1699_vm1, %v1698_v8  ;;  %1528 = vmatprep.subr.bf16.mxu1 %v1698_v8 }
 0x53c   : > { %1521 = vmatpush3.bf16.msra.mxu0 %v1602_v39 }
 0x53d   : > { %1522 = vmatprep.subr.bf16.mxu0 %v1698_v8 }
 0x59f   : > { %v852_v60 = vpop.f32.mrb[4].mxu1 }
 0x5a0   : > { %v1492_v61 = vpop.f32.mrb[5].mxu1 }
 0x5a1   : > { %v855_v62 = vpop.f32.mrb[6].mxu1 }
 0x5a2   : > { %v1493_v63 = vpop.f32.mrb[7].mxu1 }
 0x605   : > { %v900_v3 = vpop.f32.mrb[16].mxu0 }
 0x606   : > { %1003 = vrot.lane.b32.xlu0 %v900_v3, %s1706_s20  ;;  %v1498_v4 = vpop.f32.mrb[17].mxu0  ;;  %s1383_s20 = sshll.u32 %s429_s16, 3 }
 0x607   : > { %v903_v5 = vpop.f32.mrb[18].mxu0  ;;  %s431_s24 = scalar_lea.vmem [#allocation2], %s1383_s20 }
 0x608   : > { %v1499_v6 = vpop.f32.mrb[19].mxu0  ;;  %v948_v7 = vpop.f32.mrb[8].mxu1  ;;  %s1320_s30 = sshll.u32 %s431_s24, 4  ;;  %s2014_s30 = int_to_ptr.vmem [resolvable:$true] %s1320_s30 }
 0x609   : > { %1007 = vrot.lane.b32.xlu1 %v948_v7, %s1707_s21  ;;  %v1504_v9 = vpop.f32.mrb[9].mxu1  ;;  %v1409_v7 = vld [vmem:[%s2067_s12] ss:$0 sm:$0xff]  ;;  %s1634_s20 = scalar_lea.vmem %s2014_s30, 128  ;;  %s1709_s21 = smov [#allocation2]  }
 0x60a   : > { %v951_v10 = vpop.f32.mrb[10].mxu1  ;;  %p1635_p11 = scmp.ne.s32.totalorder %s2014_s30, %s1634_s20 }
 0x60b   : > { %v1505_v11 = vpop.f32.mrb[11].mxu1 }
 0x60c   : > { %p1636_p12 = pnand %p1635_p11, %p1818_p5 }
 0x60d   : > { %v996_v12 = vpop.f32.mrb[20].mxu0 }
 0x60e   : > { %1011 = vrot.lane.b32.xlu0 %v996_v12, %s1708_s22  ;;  %v1510_v13 = vpop.f32.mrb[21].mxu0  ;;  %p1637_p13 = pneg %p1636_p12  ;;  %s1638_s22 = sshll.u32 %s1709_s21, 4  ;;  %s1639_s22 = int_to_ptr.vmem [resolvable:$false] %s1638_s22 }
 0x60f   : > { %v999_v14 = vpop.f32.mrb[22].mxu0  ;;  %s1640_s2 = scalar_lea.vmem %s1639_s22, 256  ;;  %p1641_p0 = scmp.lt.s32.totalorder %s2014_s30, %s1639_s22 }
 0x610   : > { %v1511_v15 = vpop.f32.mrb[23].mxu0  ;;  %p1642_p1 = scmp.lt.s32.totalorder %s1640_s2, %s1634_s20 }
 0x612   : > { %p1643_p2 = por %p1642_p1, %p1641_p0 }
 0x614   : > { %p1644_p3 = pnand %p1643_p2, %p1637_p13 }
 0x678   : > { %v1004_v16 = vpop.permute.xlu0 %1003 }
 0x679   : > { %v1014_v18 = vsel %vm567_vm2, %v852_v60, %v1004_v16 }
 0x67b   : > { %v1008_v17 = vpop.permute.xlu1 %1007 }
 0x67c   : > { %v1016_v19 = vsel %vm1015_vm5, %v1014_v18, %v1008_v17 }
 0x680   : > { %v1012_v20 = vpop.permute.xlu0 %1011 }
 0x681   : > { %v1018_v21 = vsel %vm1017_vm6, %v1016_v19, %v1012_v20 }
 0x682   : > { %v1019_v22 = vpack.c.bf16 %v1018_v21, %v1018_v21 }
 0x684   : > { %1517 = vmatmul.mubr.msk.bf16.vlgmr.msra.gmra.mrb[12].mxu1 %vm438_vm0, %v1019_v22 }
 0x685   : > { %1544 = vmatprep.mubr.msk.bf16.mxu1 %vm1699_vm1, %v1698_v8  ;;  %1529 = vmatpush3.bf16.msra.mxu1 %v1604_v40 }
 0x686   : > { %1530 = vmatprep.subr.bf16.mxu1 %v1698_v8 }
 0x689   : > { %1531 = vmatpush3.bf16.msra.mxu1 %v1605_v48 }
 0x68a   : > { %1532 = vmatprep.subr.bf16.mxu1 %v1698_v8 }
 0x68d   : > { %1533 = vmatpush3.bf16.msra.mxu1 %v1606_v49 }
 0x68e   : > { %1534 = vmatprep.subr.bf16.mxu1 %v1698_v8 }
 0x691   : > { %1535 = vmatpush3.bf16.msra.mxu1 %v1607_v50 }
 0x692   : > { %1536 = vmatprep.subr.bf16.mxu1 %v1698_v8 }
 0x695   : > { %1537 = vmatpush3.bf16.msra.mxu1 %v1608_v51 }
 0x696   : > { %1538 = vmatprep.subr.bf16.mxu1 %v1698_v8 }
 0x699   : > { %1539 = vmatpush3.bf16.msra.mxu1 %v1609_v52 }
 0x69a   : > { %1540 = vmatprep.subr.bf16.mxu1 %v1698_v8 }
 0x69d   : > { %1541 = vmatpush3.bf16.msra.mxu1 %v1610_v53 }
 0x69e   : > { %1542 = vmatprep.subr.bf16.mxu1 %v1698_v8 }
 0x6a1   : > { %1543 = vmatpush3.bf16.msra.mxu1 %v1611_v54 }
 0x757   : > { %v1080_v24 = vpop.f32.mrb[12].mxu1 }
 0x758   : > { %v1081_v25 = vadd.f32 %v1399_v23, %v1080_v24  ;;  %v1518_v27 = vpop.f32.mrb[13].mxu1 }
 0x759   : > { %v1083_v29 = vpop.f32.mrb[14].mxu1 }
 0x75a   : > { %v1949_v31 = vadd.f32 %v1081_v25, %v1833_v0  ;;  %v1519_v26 = vpop.f32.mrb[15].mxu1  ;;  %v1603_v0 = vld [vmem:[%s2064_s9 + $0x8] sm:$0xff]  }
 0x75b   : > { %1523 = vmatpush3.bf16.msra.mxu0 %v1603_v0 }
 0x75c   : > { %v1087_v32 = vsel %vm438_vm0, %v1949_v31, 0.0 }
 0x75d   : > { %1088 = vadd.xlane.f32.xlu1 %v1087_v32 }
 0x7ea   : > { %v1089_v34 = vpop.xlane.xlu1 %1088 }
 0x7eb   : > { %v1090_v35 = vmul.f32 0.03125, %v1089_v34 }
 0x7ed   : > { %v1091_v36 = vsub.f32 %v1949_v31, %v1090_v35 }
 0x7ef   : > { %v1092_v37 = vmul.f32 %v1091_v36, %v1091_v36 }
 0x7f1   : > { %v1093_v38 = vsel %vm438_vm0, %v1092_v37, 0.0 }
 0x7f2   : > { %1094 = vadd.xlane.f32.xlu0 %v1093_v38 }
 0x87f   : > { %v1095_v41 = vpop.xlane.xlu0 %1094 }
 0x880   : > { %v1096_v42 = vmul.f32 0.03125, %v1095_v41 }
 0x882   : > { %v1097_v43 = vadd.f32 1e-05, %v1096_v42 }
 0x884   : > { %1630 = vrsqrt.f32 %v1097_v43 }
 0x88e   : > { %v1631_v44 = vpop.eup %1630 }
 0x88f   : > { %v1099_v46 = vmul.f32 %v1631_v44, %v1091_v36 }
 0x891   : > { %v1107_v47 = vmul.f32 %v1403_v45, %v1099_v46 }
 0x893   : > { %v1115_v33 = vadd.f32 %v1404_v30, %v1107_v47 }
 0x895   : > { %v1116_v28 = vpack.c.bf16 %v1115_v33, %v1115_v33 }
 0x897   : > { %1525 = vmatmul.mubr.msk.bf16.vlgmr.msra.gmra.mrb[24].mxu0 %vm438_vm0, %v1116_v28 }
 0x96a   : > { %v1177_v56 = vpop.f32.mrb[24].mxu0 }
 0x96b   : > { %v1178_v57 = vadd.f32 %v1405_v55, %v1177_v56  ;;  %v1526_v58 = vpop.f32.mrb[25].mxu0 }
 0x96c   : > { %v1180_v59 = vpop.f32.mrb[26].mxu0 }
 0x96d   : > { %v1184_v60 = vmul.f32 %v1178_v57, %v1178_v57  ;;  %v1527_v61 = vpop.f32.mrb[27].mxu0  ;;  %v1183_v8 = vmul.f32 0.5, %v1178_v57 }
 0x96f   : > { %v1185_v62 = vmul.f32 %v1184_v60, %v1178_v57 }
 0x971   : > { %v1186_v63 = vmul.f32 0.044715, %v1185_v62 }
 0x973   : > { %v1187_v1 = vadd.f32 %v1186_v63, %v1178_v57 }
 0x975   : > { %v1188_v2 = vmul.f32 0.7978846, %v1187_v1 }
 0x977   : > { %1632 = vtanh.f32 %v1188_v2 }
 0x981   : > { %v1633_v3 = vpop.eup %1632 }
 0x982   : > { %v1190_v4 = vadd.f32 1.0, %v1633_v3 }
 0x984   : > { %v1191_v5 = vmul.f32 %v1190_v4, %v1183_v8 }
 0x986   : > { %v1192_v6 = vpack.c.bf16 %v1191_v5, %v1191_v5 }
 0x988   : > { %1545 = vmatmul.mubr.bf16.vlgmr.msra.gmra.mrb[16].mxu1 %v1192_v6 }
 0xa5b   : > { %v1298_v9 = vpop.f32.mrb[16].mxu1 }
 0xa5c   : > { %v1299_v10 = vadd.f32 %v1409_v7, %v1298_v9  ;;  %v1546_v11 = vpop.f32.mrb[17].mxu1 }
 0xa5d   : > { %v1301_v12 = vpop.f32.mrb[18].mxu1 }
 0xa5e   : > { %v1304_v13 = vadd.f32 %v1299_v10, %v1949_v31  ;;  %v1547_v14 = vpop.f32.mrb[19].mxu1 }
 0xa60   : > { %1305 = vst.msk [vmem:[%s431_s24] sm:$0xff] %vm438_vm0, %v1304_v13 }
 0xa61   : > { %1647 = shalt.err (!%p1644_p3)
}
 0xa62   : > { %s1648_s0 = scalar_lea.hbm %s2012_s1, 128  ;;  %s1652_s24 = scalar_lea.hbm %s2068_s13, 256 }
 0xa63   : > { %p1649_p4 = scmp.ne.s32.totalorder %s2012_s1, %s1648_s0  ;;  %p1653_p9 = scmp.lt.u32.totalorder %s2012_s1, %s2068_s13 }
 0xa64   : > { %p1654_p10 = scmp.lt.u32.totalorder %s1652_s24, %s1648_s0  ;;  %p1656_p12 = scmp.lt.u32.totalorder %s1648_s0, %s2012_s1 }
 0xa65   : > { %p1650_p7 = pnand %p1649_p4, %p1818_p5 }
 0xa66   : > { %p1655_p11 = por %p1654_p10, %p1653_p9 }
 0xa67   : > { %p1651_p8 = pneg %p1650_p7 }
 0xa68   : > { %p1657_p13 = por %p1656_p12, %p1655_p11 }
 0xa6a   : > { %p1658_p0 = pnand %p1657_p13, %p1651_p8 }
 0xa6c   : > { %1661 = shalt.err (!%p1658_p0)
}
 0xa6d   : > { %1548 = dma.vmem_to_hbm [thread:$0]  (%p1818_p5), %s2014_s30, 128, %s2012_s1, %s1307_s29  }
 0xa6e PF: > { %p1554_p1 = scmp.ge.s32.totalorder %s1696_s28, 2  ;;  %s1332_s2 = sand.u32 1, %s1684_s25  }
 0xa6f   : > { %s1333_s20 = scalar_lea.sflag [#allocation3], %s1332_s2 }
 0xa70   : > { %p1551_p2 = pnand %p1554_p1, %p1822_p6 }
 0xa72   : > { %1679 = dma.done.wait (!%p1551_p2), %s1333_s20, 128  }
 0xa73   : > { %1681 = vsyncadd (!%p1551_p2), %s1333_s20, 4294967168  ;;  %p23_p3 = scmp.ge.s32.totalorder %s1805_s14, 4   ;;  %s2077_s25 = smov %s1688_s26 }
 0xa74   : > { %s2078_s26 = smov %s1692_s27  ;;  %s2079_s27 = smov %s1816_s17 }
 0xa75   : > { %s2080_s28 = smov %s1805_s14  ;;  %25 = sbr.rel (!%p23_p3) target bundleno = 7 (0x7), region = 107 }
 0xa7c   :  { %1338 = vsyncpa [#allocation3], 1 }
 0xa7d   :  { %1340 = vsyncpa [#allocation3 + $0x1], 1 }

</bundles_post_ra>
